<compile_context>
chip_gen: v5e
topology: v5e:2x2
jax: 0.10.0
libtpu: 0.0.40
codegen_flags: <defaults>
</compile_context>

<pallas_src>
import jax
import jax.numpy as jnp
from jax.experimental import pallas as pl
from jax.experimental.pallas import tpu as pltpu

LANES = 128
_ROW_MULT = 16          # keeps tiles (8,128)-aligned for f32 and (16,128) for bf16
_TINY_N = 64 * 1024     # below this, a single-step kernel finishes the reduction
_MAX_TILE_ROWS = 8192   # 4 MiB/tile f32; 2 inputs x 2 buffers = 16 MiB (v7x-safe)


def _round_up(x, m):
    return -(-x // m) * m


# ---------------------------------------------------------------------------
# Streaming kernel: each grid step emits a lane-dense (8,128) f32 partial sum.
# ---------------------------------------------------------------------------
def _make_partial_kernel(rows, tile_rows):
    num_tiles = -(-rows // tile_rows)
    tail_rows = rows - (num_tiles - 1) * tile_rows  # valid rows in the last block

    def kernel(out_ref, tgt_ref, psum_ref):
        o = out_ref[...].astype(jnp.float32)
        t = tgt_ref[...].astype(jnp.float32)
        margin = jnp.maximum(1.0 - o * t, 0.0)              # (tile_rows, 128) f32

        def _store(m):
            # Collapse the row-tile axis with plain VPU vreg adds; keep an
            # (8,128)-shaped partial so no cross-lane reduce happens in-kernel.
            psum_ref[...] = m.reshape(-1, 8, LANES).sum(axis=0).reshape(1, 8, LANES)

        if tail_rows == tile_rows:
            # rows divides evenly into tiles: no masking anywhere.
            _store(margin)
        else:
            i = pl.program_id(0)

            @pl.when(i < num_tiles - 1)
            def _():
                _store(margin)

            @pl.when(i == num_tiles - 1)
            def _():
                # Ragged last block: rows past `tail_rows` hold unspecified VMEM
                # data and MUST be zeroed before the sum.
                row_ids = jax.lax.broadcasted_iota(jnp.int32, margin.shape, 0)
                _store(jnp.where(row_ids < tail_rows, margin, 0.0))

    return kernel


# ---------------------------------------------------------------------------
# Tiny-input kernel: single step, full reduction in-kernel, scalar SMEM output.
# ---------------------------------------------------------------------------
def _make_small_kernel(n):
    inv_n = 1.0 / float(n)

    def kernel(out_ref, tgt_ref, mean_ref):
        o = out_ref[...].astype(jnp.float32)
        t = tgt_ref[...].astype(jnp.float32)
        margin = jnp.maximum(1.0 - o * t, 0.0)
        mean_ref[0, 0] = jnp.sum(margin) * inv_n

    return kernel


def _as_rows_by_128(x, n):
    """Flatten to (rows, 128); pads (with 1.0 -> zero hinge) only if n % 128 != 0."""
    flat = jnp.ravel(x)
    rows = -(-n // LANES)
    padded_n = rows * LANES
    if padded_n != n:
        # TODO(synk): a manual-DMA (memory_space=pl.ANY) path would avoid this
        # full-array pad copy for n % 128 != 0; the 1.0 pad is exact (1-1*1=0).
        pad = jnp.ones((padded_n - n,), dtype=flat.dtype)
        flat = jnp.concatenate([flat, pad])
    return flat.reshape(rows, LANES), rows


def hinge_loss(output, target, *, tile_rows=4096):
    """mean(clamp(1 - output*target, min=0)) via Pallas TPU kernels."""
    assert output.shape == target.shape, "output/target must have the same shape"
    n = int(output.size)
    assert n > 0

    o2, rows = _as_rows_by_128(output, n)   # original dtype kept in HBM
    t2, _ = _as_rows_by_128(target, n)

    # ---- tiny-input fast path: one launch, no separate second reduce ----
    if n <= _TINY_N:
        mean = pl.pallas_call(
            _make_small_kernel(n),
            out_shape=jax.ShapeDtypeStruct((1, 1), jnp.float32),
            in_specs=[
                pl.BlockSpec(memory_space=pltpu.MemorySpace.VMEM),
                pl.BlockSpec(memory_space=pltpu.MemorySpace.VMEM),
            ],
            out_specs=pl.BlockSpec(memory_space=pltpu.MemorySpace.SMEM),
        )(o2, t2)
        return mean[0, 0]

    # ---- streaming path ----
    tile_rows = min(max(_ROW_MULT, _round_up(tile_rows, _ROW_MULT)), _MAX_TILE_ROWS)
    if rows <= 2 * tile_rows:
        # Guarantee >= 2 balanced grid steps so v7x can shard across both TCs.
        tile_rows = max(_ROW_MULT, _round_up(-(-rows // 2), _ROW_MULT))
    num_tiles = -(-rows // tile_rows)

    itemsize = max(jnp.dtype(output.dtype).itemsize, jnp.dtype(target.dtype).itemsize)
    cost = pl.CostEstimate(
        flops=3 * n,
        transcendentals=0,
        bytes_accessed=2 * rows * LANES * itemsize + num_tiles * 8 * LANES * 4,
    )

    partials = pl.pallas_call(
        _make_partial_kernel(rows, tile_rows),
        out_shape=jax.ShapeDtypeStruct((num_tiles, 8, LANES), jnp.float32),
        grid_spec=pltpu.PrefetchScalarGridSpec(
            num_scalar_prefetch=0,
            grid=(num_tiles,),
            in_specs=[
                pl.BlockSpec((tile_rows, LANES), lambda i: (i, 0)),
                pl.BlockSpec((tile_rows, LANES), lambda i: (i, 0)),
            ],
            out_specs=pl.BlockSpec((1, 8, LANES), lambda i: (i, 0, 0)),
        ),
        compiler_params=pltpu.CompilerParams(
            # No carried accumulator -> the tile axis is truly parallel.
            dimension_semantics=("parallel",),
            vmem_limit_bytes=32 << 20,
        ),
        cost_estimate=cost,
    )(o2, t2)

    # Tiny final cross-lane reduce + mean in plain JAX (f32 throughout).
    return jnp.sum(partials) / jnp.float32(n)


def _reference(output, target):
    return jnp.mean(jnp.maximum(
        1.0 - output.astype(jnp.float32) * target.astype(jnp.float32), 0.0))


if __name__ == "__main__":
    key = jax.random.PRNGKey(0)
    keys = jax.random.split(key, 6)

    def make_inputs(k1, k2, shape):
        out = jax.random.normal(k1, shape, dtype=jnp.float32)
        tgt = jnp.sign(jax.random.normal(k2, shape, dtype=jnp.float32))
        tgt = jnp.where(tgt == 0, 1.0, tgt)   # +/-1 SVM labels
        return out, tgt

    # 1) Shipped SVM shape (tiny fast path: single launch, SMEM scalar output).
    o1, t1 = make_inputs(keys[0], keys[1], (2, 4, 16, 16))
    loss1 = hinge_loss(o1, t1)
    jax.block_until_ready(loss1)
    assert jnp.allclose(loss1, _reference(o1, t1), rtol=1e-6, atol=1e-6), (
        loss1, _reference(o1, t1))

    # 2) Larger lane-aligned input whose rows are NOT a tile multiple
    #    (exercises the multi-step parallel grid + in-kernel last-block mask).
    o2, t2 = make_inputs(keys[2], keys[3], (4, 8, 48, 128))   # n = 196608, rows = 1536
    loss2 = hinge_loss(o2, t2, tile_rows=640)
    jax.block_until_ready(loss2)
    assert jnp.allclose(loss2, _reference(o2, t2), rtol=1e-5, atol=1e-6), (
        loss2, _reference(o2, t2))

    # 3) Ragged element count (n % 128 != 0): minimal 1.0-pad + masked last block.
    o3, t3 = make_inputs(keys[4], keys[5], (3, 5, 37, 129))   # n = 71595
    loss3 = hinge_loss(o3, t3)
    jax.block_until_ready(loss3)
    assert jnp.allclose(loss3, _reference(o3, t3), rtol=1e-5, atol=1e-6), (
        loss3, _reference(o3, t3))

    print("KERNEL_OK")
</pallas_src>

<mosaic_0001>
module attributes {stable_mosaic.version = 11 : i64} {
  func.func @kernel(%arg0: memref<16x128xf32, #tpu.memory_space<vmem>>, %arg1: memref<16x128xf32, #tpu.memory_space<vmem>>, %arg2: memref<1x1xf32, #tpu.memory_space<smem>>) attributes {dimension_semantics = [], scalar_prefetch = 0 : i64, scratch_operands = 0 : i64, tpu.core_type = #tpu.core_type<tc>} {
    %c0 = arith.constant 0 : index
    %c0_0 = arith.constant 0 : index
    %0 = vector.load %arg0[%c0, %c0_0] : memref<16x128xf32, #tpu.memory_space<vmem>>, vector<16x128xf32>
    %c0_1 = arith.constant 0 : index
    %c0_2 = arith.constant 0 : index
    %1 = vector.load %arg1[%c0_1, %c0_2] : memref<16x128xf32, #tpu.memory_space<vmem>>, vector<16x128xf32>
    %2 = arith.mulf %0, %1 : vector<16x128xf32>
    %cst = arith.constant 1.000000e+00 : f32
    %3 = vector.broadcast %cst : f32 to vector<16x128xf32>
    %4 = arith.subf %3, %2 : vector<16x128xf32>
    %cst_3 = arith.constant 0.000000e+00 : f32
    %5 = vector.broadcast %cst_3 : f32 to vector<16x128xf32>
    %6 = arith.maximumf %4, %5 : vector<16x128xf32>
    %7 = vector.shape_cast %6 : vector<16x128xf32> to vector<1x16x128xf32>
    %cst_4 = arith.constant dense<0.000000e+00> : vector<1xf32>
    %8 = vector.multi_reduction <add>, %7, %cst_4 [1, 2] : vector<1x16x128xf32> to vector<1xf32>
    %9 = vector.shape_cast %8 : vector<1xf32> to vector<1x1x1xf32>
    %10 = vector.extract %9[0, 0, 0] : f32 from vector<1x1x1xf32>
    %cst_5 = arith.constant 4.8828125E-4 : f32
    %11 = arith.mulf %10, %cst_5 : f32
    %c0_6 = arith.constant 0 : index
    %c0_7 = arith.constant 0 : index
    %12 = memref.load %arg2[%c0_6, %c0_7] : memref<1x1xf32, #tpu.memory_space<smem>>
    memref.store %11, %arg2[%c0_6, %c0_7] : memref<1x1xf32, #tpu.memory_space<smem>>
    return
  }
}

</mosaic_0001>

<bundles_post_ra>
// kernel: tpu_custom_call.1
= control target key start
LH: loop header
LB: loop body
LE: loop exit
PB: predicated region body
PF: predicated region fallthrough
CT: control target
= control target key end

     0   :  { %7 = vsyncpa [#allocation3], 0  ;;  %s186_s0 = inlined_call_operand.hbm [shape: f32[16,128], index: 0, kind: input, shape index: {}]   ;;  %s187_s1 = inlined_call_operand.hbm [shape: f32[16,128], index: 1, kind: input, shape index: {}]   ;;  %s188_s2 = inlined_call_operand.hbm [shape: f32[1,1], index: 2, kind: output, shape index: {}]  }
   0x1   :  { %8 = vsyncpa [#allocation6], 0 }
   0x2   :  { %9 = vsyncpa [#allocation4], 0  ;;  %s14_s11 = sshll.u32 %s186_s0, 4  ;;  %s157_s12 = smov [#allocation2]   ;;  %s15_s11 = int_to_ptr.hbm [resolvable:$true] %s14_s11 }
   0x3   :  { %s16_s13 = sshll.u32 %s157_s12, 4  ;;  %s27_s16 = sshll.u32 %s187_s1, 4  ;;  %s17_s13 = int_to_ptr.vmem [resolvable:$true] %s16_s13  ;;  %s28_s16 = int_to_ptr.hbm [resolvable:$true] %s27_s16 }
   0x4   :  { %s158_s17 = smov 128   ;;  %s159_s18 = smov 8  }
   0x5   :  { %22 = dma.hbm_to_vmem [thread:$0]  %s15_s11, 256, %s17_s13, [#allocation3], %s158_s17, %s158_s17, %s159_s18  }
   0x6   :  { %s160_s19 = smov [#allocation5]  }
   0x7   :  { %s29_s20 = sshll.u32 %s160_s19, 4  ;;  %s30_s20 = int_to_ptr.vmem [resolvable:$true] %s29_s20 }
   0x8   :  { %35 = dma.hbm_to_vmem [thread:$0]  %s28_s16, 256, %s30_s20, [#allocation6], %s158_s17, %s158_s17, %s159_s18  }
   0x9   :  { %151 = dma.done.wait [#allocation3], 256  }
   0xa   :  { %152 = vsyncadd [#allocation3], 4294967040 }
   0xb   :  { %153 = dma.done.wait [#allocation6], 256  }
   0xc   :  { %154 = vsyncadd [#allocation6], 4294967040  ;;  %v44_v0 = vld [vmem:[#allocation2] sm:$0xff]  ;;  %v45_v1 = vld [vmem:[#allocation2 + $0x8] sm:$0xff]  ;;  %s72_s21 = sshll.u32 %s188_s2, 4  ;;  %s161_s24 = smov [#allocation7]   ;;  %s73_s21 = int_to_ptr.hbm [resolvable:$true] %s72_s21 }
   0xd   :  { %v46_v2 = vld [vmem:[#allocation5] sm:$0xff]  ;;  %v47_v3 = vld [vmem:[#allocation5 + $0x8] sm:$0xff] }
   0xe   :  { %v48_v4 = vmul.f32 %v46_v2, %v44_v0  ;;  %v49_v5 = vmul.f32 %v47_v3, %v45_v1 }
  0x10   :  { %v50_v6 = vsub.f32 1.0, %v48_v4  ;;  %v51_v7 = vsub.f32 1.0, %v49_v5 }
  0x12   :  { %v52_v8 = vmax.f32 %v50_v6, 0.0  ;;  %v53_v9 = vmax.f32 %v51_v7, 0.0 }
  0x14   :  { %v54_v10 = vadd.f32 %v53_v9, %v52_v8 }
  0x16   :  { %55 = vadd.xlane.f32.xlu0 %v54_v10 }
  0x89   :  { %v56_v11 = vpop.xlane.xlu0 %55 }
  0x8a   :  { %v57_v12 = vrot.slane %v56_v11, 4 }
  0x8c   :  { %v58_v13 = vadd.f32 %v57_v12, %v56_v11 }
  0x8e   :  { %v59_v14 = vrot.slane %v58_v13, 2 }
  0x90   :  { %v60_v15 = vadd.f32 %v59_v14, %v58_v13 }
  0x92   :  { %v61_v16 = vrot.slane %v60_v15, 1 }
  0x94   :  { %v62_v17 = vadd.f32 %v61_v16, %v60_v15 }
  0x96   :  { %84 = vpush %v62_v17 }
  0xc7   :  { %s85_s22 = spop %84 }
  0xc8   :  { %s64_s23 = smul.f32 0.00048828125, %s85_s22 }
  0xca   :  { %66 = sst [smem:[#allocation7]] %s64_s23 }
  0xcb   :  { %75 = dma.smem_to_hbm %s161_s24, 16, %s73_s21, [#allocation4]  }
  0xcc   :  { %155 = dma.done.wait [#allocation4], 16  }
  0xcd   :  { %156 = vsyncadd [#allocation4], 4294967280 }
  0xce   :  { %80 = sfence }
  0xcf   :  { %81 = vsyncpa [#allocation3], 1 }
  0xd0   :  { %82 = vsyncpa [#allocation6], 1 }
  0xd1   :  { %83 = vsyncpa [#allocation4], 1 }

</bundles_post_ra>
